<compile_context>
chip_gen: v7x
topology: tpu7x:2x2x1
jax: 0.10.0
libtpu: 0.0.40
codegen_flags: <defaults>
</compile_context>

<pallas_src>
import math

import jax
import jax.numpy as jnp
from jax import lax
from jax.experimental import pallas as pl
from jax.experimental.pallas import tpu as pltpu


def _round_up(x, m):
    return ((x + m - 1) // m) * m


def _vmem_capacity_bytes():
    try:
        return int(pltpu.get_tpu_info().vmem_capacity_bytes)
    except Exception:
        return 64 * 1024 * 1024  # conservative: v7x per-TensorCore VMEM


# --------------------------------------------------------------------------
# Kernels
# --------------------------------------------------------------------------

def _proj_kernel_fullk(x_ref, w_ref, b_ref, o_ref):
    # x_ref: (tm, K)  w_ref: (tn, K)  b_ref: (1, tn)  o_ref: (tm, tn)
    acc = lax.dot_general(
        x_ref[...], w_ref[...],
        dimension_numbers=(((1,), (1,)), ((), ())),   # contract shared K axis
        preferred_element_type=jnp.float32,
    )
    o_ref[...] = (acc + b_ref[...].astype(jnp.float32)).astype(o_ref.dtype)


def _proj_kernel_ksplit(x_ref, w_ref, b_ref, o_ref, acc_ref):
    # grid = (vocab_tiles, M_tiles, K_tiles); K innermost ("arbitrary").
    k = pl.program_id(2)

    @pl.when(k == 0)
    def _():
        acc_ref[...] = jnp.zeros_like(acc_ref)

    acc_ref[...] += lax.dot_general(
        x_ref[...], w_ref[...],
        dimension_numbers=(((1,), (1,)), ((), ())),
        preferred_element_type=jnp.float32,
    )

    @pl.when(k == pl.num_programs(2) - 1)
    def _():
        o_ref[...] = (acc_ref[...] + b_ref[...].astype(jnp.float32)
                      ).astype(o_ref.dtype)


# --------------------------------------------------------------------------
# Wrapper
# --------------------------------------------------------------------------

def projection(x, weight, bias, *, tm=None, tn=None, tk=None,
               vmem_budget_bytes=None):
    """y = x @ weight.T + bias  (nn.Linear semantics).

    x:      (batch, seq, d_model)
    weight: (vocab_size, d_model)  -- native PyTorch Linear layout
    bias:   (vocab_size,)
    returns (batch, seq, vocab_size)
    """
    batch, seq, d_model = x.shape
    vocab_size, k_w = weight.shape
    assert k_w == d_model, "weight must be (vocab_size, d_model)"
    M = batch * seq
    out_dtype = x.dtype

    x_bytes = jnp.dtype(x.dtype).itemsize
    w_bytes = jnp.dtype(weight.dtype).itemsize
    b_bytes = jnp.dtype(bias.dtype).itemsize
    o_bytes = jnp.dtype(out_dtype).itemsize

    # Sublane granularity for the x/output row dimension.
    sub = 8 if x_bytes >= 4 else (16 if x_bytes == 2 else 32)

    # --- device-aware VMEM budget -----------------------------------------
    cap = _vmem_capacity_bytes()
    if vmem_budget_bytes is None:
        # ~100 MiB on v5e/v6e (128 MiB VMEM), ~48 MiB on v7x (64 MiB VMEM).
        vmem_budget_bytes = min(cap - (16 << 20), 100 << 20)
    vmem_budget_bytes = max(int(vmem_budget_bytes), 8 << 20)

    def footprint(tm_, tn_, tk_):
        # double-buffered tiles + f32 accumulate / bias-add temporary
        return (2 * tm_ * tk_ * x_bytes          # x tile
                + 2 * tn_ * tk_ * w_bytes        # weight tile (own itemsize)
                + 2 * tn_ * b_bytes              # bias tile
                + 2 * tm_ * tn_ * o_bytes        # output tile
                + tm_ * tn_ * 4)                 # f32 accumulator / temp

    # --- tile selection -----------------------------------------------------
    if tm is None:
        # Bigger tm for prefill when VMEM allows it (halves per-step overhead
        # and output writebacks); 256 otherwise (v5e / v7x budgets).
        tm = 512 if (M >= 512 and vmem_budget_bytes >= (80 << 20)) else 256
    tm = max(sub, _round_up(int(tm), sub))
    tm = min(tm, _round_up(M, sub))

    # --- K split decision (v7x: full-K weight stripe may not fit) -----------
    if tk is not None:
        tk = int(tk)
        assert d_model % tk == 0, "tk must divide d_model exactly"
        use_ksplit = tk < d_model
    else:
        tk = d_model
        use_ksplit = False
        if footprint(tm, 1024, d_model) > vmem_budget_bytes:
            cand = min(2048, d_model)
            while cand >= 128:
                if (d_model % cand == 0
                        and footprint(tm, 1024, cand) <= vmem_budget_bytes):
                    tk = cand
                    use_ksplit = True
                    break
                cand //= 2

    if tn is None:
        tn = 4096
        while tn > 128 and footprint(tm, tn, tk) > vmem_budget_bytes:
            tn //= 2
    tn = max(128, _round_up(int(tn), 128))
    tn = min(tn, _round_up(vocab_size, 128))

    # --- grid / specs (no padding: Pallas masks partial last blocks) --------
    n_j = pl.cdiv(vocab_size, tn)   # vocab tiles (outer -> weight fetched once)
    n_i = pl.cdiv(M, tm)            # row tiles   (inner -> weight resident)

    x2d = x.reshape(M, d_model)
    b2d = bias.reshape(1, vocab_size)

    foot = footprint(tm, tn, tk)
    vmem_limit = int(min(cap, max(foot + (8 << 20), 32 << 20)))

    x_reads = n_j                       # x is re-streamed once per vocab tile
    w_reads = n_i if use_ksplit else 1  # weight resident across i in full-K
    cost = pl.CostEstimate(
        flops=2 * M * d_model * vocab_size,
        transcendentals=0,
        bytes_accessed=int(x_reads * M * d_model * x_bytes
                           + w_reads * vocab_size * d_model * w_bytes
                           + vocab_size * b_bytes
                           + M * vocab_size * o_bytes),
    )

    if not use_ksplit:
        out2d = pl.pallas_call(
            _proj_kernel_fullk,
            out_shape=jax.ShapeDtypeStruct((M, vocab_size), out_dtype),
            grid=(n_j, n_i),
            in_specs=[
                # x tile: changes with inner i only.
                pl.BlockSpec((tm, d_model), lambda j, i: (i, 0)),
                # weight tile: depends only on outer j -> DMA'd once per j.
                pl.BlockSpec((tn, d_model), lambda j, i: (j, 0)),
                # bias row tile: also invariant to i.
                pl.BlockSpec((1, tn), lambda j, i: (0, j)),
            ],
            out_specs=pl.BlockSpec((tm, tn), lambda j, i: (i, j)),
            compiler_params=pltpu.CompilerParams(
                # Core-parallelize only the vocab axis (v7x): avoids the two
                # TensorCores duplicating weight DMA. No-op on v5e/v6e.
                dimension_semantics=("parallel", "arbitrary"),
                vmem_limit_bytes=vmem_limit,
            ),
            cost_estimate=cost,
        )(x2d, weight, b2d)
    else:
        n_k = d_model // tk
        out2d = pl.pallas_call(
            _proj_kernel_ksplit,
            out_shape=jax.ShapeDtypeStruct((M, vocab_size), out_dtype),
            grid=(n_j, n_i, n_k),
            in_specs=[
                pl.BlockSpec((tm, tk), lambda j, i, k: (i, k)),
                pl.BlockSpec((tn, tk), lambda j, i, k: (j, k)),
                pl.BlockSpec((1, tn), lambda j, i, k: (0, j)),
            ],
            out_specs=pl.BlockSpec((tm, tn), lambda j, i, k: (i, j)),
            scratch_shapes=[pltpu.VMEM((tm, tn), jnp.float32)],
            compiler_params=pltpu.CompilerParams(
                dimension_semantics=("parallel", "arbitrary", "arbitrary"),
                vmem_limit_bytes=vmem_limit,
            ),
            cost_estimate=cost,
        )(x2d, weight, b2d)

    return out2d.reshape(batch, seq, vocab_size)


def init_projection_params(key, d_model, vocab_size, dtype=jnp.float32):
    """Deterministic init mirroring nn.Linear's default (uniform +-1/sqrt(in))."""
    k_w, k_b = jax.random.split(key)
    bound = 1.0 / math.sqrt(d_model)
    weight = jax.random.uniform(
        k_w, (vocab_size, d_model), dtype=dtype, minval=-bound, maxval=bound)
    bias = jax.random.uniform(
        k_b, (vocab_size,), dtype=dtype, minval=-bound, maxval=bound)
    return weight, bias


def _reference(x, weight, bias):
    return jnp.einsum("bsd,vd->bsv", x, weight,
                      precision=lax.Precision.HIGHEST) + bias


if __name__ == "__main__":
    # 1) Basic, tile-aligned case.
    batch, seq, d_model, vocab_size = 2, 8, 32, 128
    key = jax.random.PRNGKey(0)
    k_x, k_p = jax.random.split(key)
    x = jax.random.normal(k_x, (batch, seq, d_model), dtype=jnp.float32)
    weight, bias = init_projection_params(k_p, d_model, vocab_size)

    y = jax.block_until_ready(projection(x, weight, bias))
    y_ref = _reference(x, weight, bias)
    assert y.shape == (batch, seq, vocab_size)
    assert jnp.allclose(y, y_ref, atol=5e-3, rtol=5e-3)

    # 2) Non-tile-aligned vocab and M (partial blocks masked by Pallas,
    #    no wrapper-side padding or output slicing).
    vocab2 = 200
    w2, b2 = init_projection_params(jax.random.PRNGKey(1), d_model, vocab2)
    x2 = jax.random.normal(jax.random.PRNGKey(2), (3, 5, d_model), jnp.float32)
    y2 = jax.block_until_ready(projection(x2, w2, b2))
    assert y2.shape == (3, 5, vocab2)
    assert jnp.allclose(y2, _reference(x2, w2, b2), atol=5e-3, rtol=5e-3)

    # 3) Exercise the K-split accumulator path (forced via small tk).
    d3, vocab3 = 256, 384
    w3, b3 = init_projection_params(jax.random.PRNGKey(3), d3, vocab3)
    x3 = jax.random.normal(jax.random.PRNGKey(4), (2, 4, d3), jnp.float32)
    y3 = jax.block_until_ready(projection(x3, w3, b3, tm=8, tn=128, tk=128))
    assert y3.shape == (2, 4, vocab3)
    assert jnp.allclose(y3, _reference(x3, w3, b3), atol=5e-3, rtol=5e-3)

    print("KERNEL_OK")
</pallas_src>

<mosaic_0001>
module attributes {stable_mosaic.version = 11 : i64} {
  func.func @_proj_kernel_fullk(%arg0: i32, %arg1: i32, %arg2: memref<16x32xf32, #tpu.memory_space<vmem>>, %arg3: memref<128x32xf32, #tpu.memory_space<vmem>>, %arg4: memref<1x128xf32, #tpu.memory_space<vmem>>, %arg5: memref<16x128xf32, #tpu.memory_space<vmem>>) attributes {dimension_semantics = [#tpu.dimension_semantics<parallel>, #tpu.dimension_semantics<arbitrary>], iteration_bounds = array<i64: 1, 1>, scalar_prefetch = 0 : i64, scratch_operands = 0 : i64, tpu.core_type = #tpu.core_type<tc>, window_params = [{transform_indices = @transform_0, window_bounds = array<i64: 16, 32>}, {transform_indices = @transform_1, window_bounds = array<i64: 128, 32>}, {transform_indices = @transform_2, window_bounds = array<i64: 1, 128>}, {transform_indices = @transform_3, window_bounds = array<i64: 16, 128>}]} {
    %c0 = arith.constant 0 : index
    %c0_0 = arith.constant 0 : index
    %0 = vector.load %arg2[%c0, %c0_0] : memref<16x32xf32, #tpu.memory_space<vmem>>, vector<16x32xf32>
    %c0_1 = arith.constant 0 : index
    %c0_2 = arith.constant 0 : index
    %1 = vector.load %arg3[%c0_1, %c0_2] : memref<128x32xf32, #tpu.memory_space<vmem>>, vector<128x32xf32>
    %cst = arith.constant dense<0.000000e+00> : vector<16x128xf32>
    %2 = tpu.matmul %0, %1, %cst {dimension_numbers = #tpu.dot_dimension_numbers<[1], [1], [0], [0], [0, 0, 1, 0], [], []>} : vector<16x32xf32>, vector<128x32xf32>, vector<16x128xf32> -> vector<16x128xf32>
    %c0_3 = arith.constant 0 : index
    %c0_4 = arith.constant 0 : index
    %3 = vector.load %arg4[%c0_3, %c0_4] : memref<1x128xf32, #tpu.memory_space<vmem>>, vector<1x128xf32>
    %4 = vector.broadcast %3 : vector<1x128xf32> to vector<16x128xf32>
    %5 = arith.addf %2, %4 : vector<16x128xf32>
    %c0_5 = arith.constant 0 : index
    %c0_6 = arith.constant 0 : index
    %6 = vector.load %arg5[%c0_5, %c0_6] : memref<16x128xf32, #tpu.memory_space<vmem>>, vector<16x128xf32>
    tpu.vector_store %arg5[%c0_5, %c0_6], %5 {strides = array<i32>} : memref<16x128xf32, #tpu.memory_space<vmem>>, vector<16x128xf32>,
    return
  }
  func.func @transform_0(%arg0: i32, %arg1: i32) -> (i32, i32) {
    %c0_i32 = arith.constant 0 : i32
    %c0_i32_0 = arith.constant 0 : i32
    return %arg1, %c0_i32 : i32, i32
  }
  func.func @transform_1(%arg0: i32, %arg1: i32) -> (i32, i32) {
    %c0_i32 = arith.constant 0 : i32
    %c0_i32_0 = arith.constant 0 : i32
    return %arg0, %c0_i32 : i32, i32
  }
  func.func @transform_2(%arg0: i32, %arg1: i32) -> (i32, i32) {
    %c0_i32 = arith.constant 0 : i32
    %c0_i32_0 = arith.constant 0 : i32
    return %c0_i32, %arg0 : i32, i32
  }
  func.func @transform_3(%arg0: i32, %arg1: i32) -> (i32, i32) {
    %c0_i32 = arith.constant 0 : i32
    return %arg1, %arg0 : i32, i32
  }
}

</mosaic_0001>

<bundles_post_ra>
// kernel: tpu_custom_call.1
= control target key start
LH: loop header
LB: loop body
LE: loop exit
PB: predicated region body
PF: predicated region fallthrough
CT: control target
= control target key end

     0   :  { %vm40_vm0 = vcmask 261120   ;;  %s467_s0 = inlined_call_operand.vmem [shape: f32[16,32], index: 0, kind: input, shape index: {}]   ;;  %s468_s1 = inlined_call_operand.vmem [shape: f32[128,32], index: 1, kind: input, shape index: {}]   ;;  %s469_s2 = inlined_call_operand.vmem [shape: f32[1,128], index: 2, kind: input, shape index: {}]   ;;  %s470_s3 = inlined_call_operand.hbm [shape: f32[16,128], index: 3, kind: output, shape index: {}]  }
   0x1   :  { %v17_v0 = vld [vmem:[%s468_s1] sm:$0xff]  ;;  %v18_v1 = vld [vmem:[%s468_s1 + $0x8] sm:$0xff]  ;;  %v19_v2 = vld [vmem:[%s468_s1 + $0x10] sm:$0xff] }
   0x2   :  { %v260_v3 = vpack.c.bf16 %v18_v1, %v17_v0  ;;  %vm369_vm1 = vmpackc.low %vm40_vm0, %vm40_vm0  ;;  %v20_v5 = vld [vmem:[%s468_s1 + $0x18] sm:$0xff]  ;;  %v15_v7 = vld [vmem:[%s467_s0] sm:$0xff] }
   0x3   :  { %v266_v6 = vpack.c.bf16 %v20_v5, %v19_v2  ;;  %v21_v8 = vld [vmem:[%s468_s1 + $0x20] sm:$0xff]  ;;  %v22_v9 = vld [vmem:[%s468_s1 + $0x28] sm:$0xff]  ;;  %257 = vmatprep.mubr.msk.f32.mxu0 %vm40_vm0, %v15_v7 }
   0x4   :  { %262 = vmatprep.subr.msk.bf16.mxu0 %vm369_vm1, %v260_v3 }
   0x5   :  { %265 = vmatpush3.bf16.xpose.msk.msra.mxu0 %vm369_vm1, %v260_v3 }
   0x6   :  { %268 = vmatprep.subr.msk.bf16.mxu0 %vm369_vm1, %v266_v6 }
   0x7   :  { %8 = vsyncpa [#allocation3], 0  ;;  %v272_v10 = vpack.c.bf16 %v22_v9, %v21_v8  ;;  %v23_v11 = vld [vmem:[%s468_s1 + $0x30] sm:$0xff]  ;;  %v24_v12 = vld [vmem:[%s468_s1 + $0x38] sm:$0xff] }
   0x8   :  { %v278_v13 = vpack.c.bf16 %v24_v12, %v23_v11  ;;  %v25_v14 = vld [vmem:[%s468_s1 + $0x40] sm:$0xff]  ;;  %v26_v15 = vld [vmem:[%s468_s1 + $0x48] sm:$0xff]  ;;  %v27_v17 = vld [vmem:[%s468_s1 + $0x50] sm:$0xff] }
   0x9   :  { %v284_v16 = vpack.c.bf16 %v26_v15, %v25_v14  ;;  %v28_v18 = vld [vmem:[%s468_s1 + $0x58] sm:$0xff]  ;;  %v29_v20 = vld [vmem:[%s468_s1 + $0x60] sm:$0xff]  ;;  %v30_v21 = vld [vmem:[%s468_s1 + $0x68] sm:$0xff] }
   0xa   :  { %v290_v19 = vpack.c.bf16 %v28_v18, %v27_v17  ;;  %v296_v22 = vpack.c.bf16 %v30_v21, %v29_v20  ;;  %v31_v23 = vld [vmem:[%s468_s1 + $0x70] sm:$0xff]  ;;  %v32_v24 = vld [vmem:[%s468_s1 + $0x78] sm:$0xff]  ;;  %v16_v26 = vld [vmem:[%s467_s0 + $0x8] sm:$0xff]  ;;  %s335_s1 = smov [#allocation2]  }
   0xb   :  { %v302_v25 = vpack.c.bf16 %v32_v24, %v31_v23  ;;  %v188_v27 = vld [vmem:[%s469_s2] ss:$0 sm:$0xff]  ;;  %s177_s23 = sshll.u32 %s335_s1, 4  ;;  %s178_s23 = int_to_ptr.vmem [resolvable:$true] %s177_s23 }
   0xc   :  { %s311_s24 = scalar_lea.vmem %s178_s23, 256  ;;  %p316_p1 = scmp.lt.s32.totalorder %s178_s23, %s178_s23 }
   0xd   :  { %271 = vmatpush3.bf16.xpose.msk.msra.mxu0 %vm369_vm1, %v266_v6  ;;  %p312_p0 = scmp.ne.s32.totalorder %s178_s23, %s311_s24  ;;  %p317_p2 = scmp.lt.s32.totalorder %s311_s24, %s311_s24 }
   0xe   :  { %274 = vmatprep.subr.msk.bf16.mxu0 %vm369_vm1, %v272_v10 }
   0xf   :  { %p318_p3 = por %p317_p2, %p316_p1 }
  0x11   :  { %p319_p4 = pnand %p318_p3, %p312_p0 }
  0x15   :  { %277 = vmatpush3.bf16.xpose.msk.msra.mxu0 %vm369_vm1, %v272_v10 }
  0x16   :  { %280 = vmatprep.subr.msk.bf16.mxu0 %vm369_vm1, %v278_v13 }
  0x1d   :  { %283 = vmatpush3.bf16.xpose.msk.msra.mxu0 %vm369_vm1, %v278_v13 }
  0x1e   :  { %286 = vmatprep.subr.msk.bf16.mxu0 %vm369_vm1, %v284_v16 }
  0x25   :  { %289 = vmatpush3.bf16.xpose.msk.msra.mxu0 %vm369_vm1, %v284_v16 }
  0x26   :  { %292 = vmatprep.subr.msk.bf16.mxu0 %vm369_vm1, %v290_v19 }
  0x2d   :  { %295 = vmatpush3.bf16.xpose.msk.msra.mxu0 %vm369_vm1, %v290_v19 }
  0x2e   :  { %298 = vmatprep.subr.msk.bf16.mxu0 %vm369_vm1, %v296_v22 }
  0x35   :  { %301 = vmatpush3.bf16.xpose.msk.msra.mxu0 %vm369_vm1, %v296_v22 }
  0x36   :  { %304 = vmatprep.subr.msk.bf16.mxu0 %vm369_vm1, %v302_v25 }
  0x3d   :  { %307 = vmatpush3.bf16.xpose.msk.msra.mxu0 %vm369_vm1, %v302_v25 }
  0x44   :  { %258 = vmatmul.mubr.msk.f32.vlgmr.msra.gmra.mrb[0].mxu0 %vm40_vm0, %v16_v26 }
 0x117   :  { %v259_v28 = vpop.f32.mrb[0].mxu0 }
 0x118   :  { %v167_v29 = vadd.f32 %v259_v28, %v188_v27  ;;  %v161_v30 = vpop.f32.mrb[1].mxu0 }
 0x119   :  { %v162_v31 = vadd.f32 %v188_v27, %v161_v30 }
 0x11a   :  { %171 = vst [vmem:[#allocation2 + $0x8] sm:$0xff] %v167_v29 }
 0x11b   :  { %170 = vst [vmem:[#allocation2] sm:$0xff] %v162_v31 }
 0x11c   :  { %322 = shalt.err (!%p319_p4)
}
 0x11d   :  { %s323_s2 = scalar_lea.hbm %s470_s3, 256 }
 0x11e   :  { %p324_p5 = scmp.ne.s32.totalorder %s470_s3, %s323_s2  ;;  %p327_p6 = scmp.lt.u32.totalorder %s323_s2, %s470_s3 }
 0x120   :  { %p329_p7 = pnand %p327_p6, %p324_p5 }
 0x122   :  { %332 = shalt.err (!%p329_p7)
}
 0x123   :  { %s336_s30 = smov 128   ;;  %s337_s4 = smov 8  }
 0x124   :  { %183 = dma.vmem_to_hbm [thread:$0]  %s178_s23, 256, %s470_s3, [#allocation3], %s336_s30, %s336_s30, %s337_s4  }
 0x125   :  { %333 = dma.done.wait [#allocation3], 256  }
 0x126   :  { %334 = vsyncadd [#allocation3], 4294967040 }
 0x127   :  { %187 = vsyncpa [#allocation3], 1 }

</bundles_post_ra>
